<compile_context>
chip_gen: v7x
topology: tpu7x:2x2x1
jax: 0.10.0
libtpu: 0.0.40
codegen_flags: <defaults>
</compile_context>

<pallas_src>
import numpy as np
import jax
import jax.numpy as jnp
from jax.experimental import pallas as pl
from jax.experimental.pallas import tpu as pltpu


def _pool2_matrix(h, w):
    """(h*w, (h//2)*(w//2)) matrix averaging 2x2 spatial blocks (row-major flatten)."""
    ho, wo = h // 2, w // 2
    idx = np.arange(h * w)
    r, c = idx // w, idx % w
    col = (r // 2) * wo + (c // 2)
    m = np.zeros((h * w, ho * wo), dtype=np.float32)
    m[idx, col] = 0.25
    return m


def _make_kernel(scales, norm, weights, counts, out_tile_shape):
    """weights[s]/counts[s] are static Python floats/ints baked into the kernel."""

    def _partial_sum(x):
        if norm == "L1":
            return jnp.sum(jnp.abs(x))      # nn.L1Loss numerator (sum; /count folded)
        return jnp.sum(x * x)               # nn.MSELoss numerator

    def kernel(*refs):
        o_ref, t_ref = refs[0], refs[1]
        m_refs = refs[2:2 + (scales - 1)]
        out_ref = refs[2 + (scales - 1)]

        # Cast to f32 inside the kernel (inputs arrive in native dtype).
        d = o_ref[...].astype(jnp.float32) - t_ref[...].astype(jnp.float32)

        # scale 0: AvgPool2d(1, 1) is the identity.
        acc = jnp.float32(weights[0] / counts[0]) * _partial_sum(d)

        # scales >= 1: chained 2x2 average pooling as small MXU matmuls.
        p = d
        for s in range(1, scales):
            p = jnp.dot(p, m_refs[s - 1][...], preferred_element_type=jnp.float32)
            acc = acc + jnp.float32(weights[s] / counts[s]) * _partial_sum(p)

        # Lane-dense per-tile partial; wrapper sums lane (0,0) across tiles.
        out_ref[...] = jnp.full(out_tile_shape, acc, dtype=jnp.float32)

    return kernel


def multi_scale_loss(output, target, scales=3, norm="L1"):
    """output, target: NCHW arrays (any float dtype).  Returns scalar f32 loss."""
    assert output.shape == target.shape
    N, C, H, W = output.shape
    k_max = 2 ** (scales - 1)
    assert H % k_max == 0 and W % k_max == 0, (
        "chained-pooling kernel requires H, W divisible by 2**(scales-1)")

    nc = N * C
    hw = H * W

    # Keep native dtype: cast to f32 happens inside the kernel (halves HBM
    # traffic for bf16 inputs on the memory-bound path).
    o2 = output.reshape(nc, hw)
    t2 = target.reshape(nc, hw)

    # --- chained 2x2 pool matrices ------------------------------------------
    pool_mats = []
    h, w = H, W
    for _ in range(1, scales):
        pool_mats.append(jnp.asarray(_pool2_matrix(h, w)))
        h //= 2
        w //= 2
    pool_bytes = sum(int(m.size) * 4 for m in pool_mats)

    # --- tile-size selection over the N*C axis -----------------------------
    itemsize = int(jnp.dtype(output.dtype).itemsize)
    # per-row VMEM footprint: 2 inputs x 2 pipeline buffers (native dtype)
    # + f32 difference + largest f32 pooled intermediate.
    per_row_bytes = hw * (2 * 2 * itemsize) + hw * 4 + (hw // 4) * 4
    vmem_budget = 24 * 1024 * 1024                      # conservative, fits v7x
    avail = max(vmem_budget - 2 * pool_bytes, per_row_bytes * 8)
    tile_nc = (avail // per_row_bytes) // 8 * 8
    tile_nc = max(8, min(1024, tile_nc))
    tile_nc = min(tile_nc, -(-nc // 8) * 8)             # no pointless padding

    nc_pad = -(-nc // tile_nc) * tile_nc
    if nc_pad != nc:
        # Zero rows contribute 0 to the L1/L2 sums; division uses the true nc.
        pad = nc_pad - nc
        o2 = jnp.pad(o2, ((0, pad), (0, 0)))
        t2 = jnp.pad(t2, ((0, pad), (0, 0)))
    num_tiles = nc_pad // tile_nc

    weights = [1.0 / (2 ** s) for s in range(scales)]                     # torch.FloatTensor
    counts = [nc * (H // 2 ** s) * (W // 2 ** s) for s in range(scales)]  # true elem counts

    out_tile_shape = (1, 8, 128)
    kernel = _make_kernel(scales, norm, weights, counts, out_tile_shape)

    in_specs = [
        pl.BlockSpec((tile_nc, hw), lambda i: (i, 0)),
        pl.BlockSpec((tile_nc, hw), lambda i: (i, 0)),
    ]
    for m in pool_mats:
        in_specs.append(
            pl.BlockSpec(tuple(int(x) for x in m.shape), lambda i: (0, 0)))
    out_specs = pl.BlockSpec(out_tile_shape, lambda i: (i, 0, 0))

    # --- cost estimate -------------------------------------------------------
    flops = 0
    hw_prev = hw
    for s in range(1, scales):
        hw_cur = (H // 2 ** s) * (W // 2 ** s)
        flops += 2 * nc_pad * hw_prev * hw_cur
        hw_prev = hw_cur
    bytes_accessed = (2 * nc_pad * hw * itemsize
                      + pool_bytes
                      + num_tiles * 8 * 128 * 4)

    out = pl.pallas_call(
        kernel,
        out_shape=jax.ShapeDtypeStruct((num_tiles, 8, 128), jnp.float32),
        grid=(num_tiles,),
        in_specs=in_specs,
        out_specs=out_specs,
        compiler_params=pltpu.CompilerParams(
            dimension_semantics=("parallel",),
            vmem_limit_bytes=48 * 1024 * 1024),
        cost_estimate=pl.CostEstimate(
            flops=flops, transcendentals=0, bytes_accessed=bytes_accessed),
    )(o2, t2, *pool_mats)

    # Tiny final reduction over per-tile partials in the wrapper.
    return jnp.sum(out[:, 0, 0])


def _reference_loss(o, t, scales=3, norm="L1"):
    """Pure-JAX reference matching the PyTorch module."""
    N, C, H, W = o.shape
    total = jnp.float32(0.0)
    for s in range(scales):
        k = 2 ** s
        po = o.reshape(N, C, H // k, k, W // k, k).mean(axis=(3, 5))
        pt = t.reshape(N, C, H // k, k, W // k, k).mean(axis=(3, 5))
        d = po - pt
        if norm == "L1":
            l = jnp.mean(jnp.abs(d))
        else:
            l = jnp.mean(d * d)
        total = total + (1.0 / 2 ** s) * l
    return total


if __name__ == "__main__":
    key = jax.random.PRNGKey(0)
    k1, k2 = jax.random.split(key)
    # small shapes consistent with the module's NCHW pooling inputs
    output = jax.random.normal(k1, (2, 4, 16, 16), dtype=jnp.float32)
    target = jax.random.normal(k2, (2, 4, 16, 16), dtype=jnp.float32)

    loss = multi_scale_loss(output, target, scales=3, norm="L1")
    loss = jax.block_until_ready(loss)

    ref = jax.block_until_ready(_reference_loss(output, target, scales=3, norm="L1"))
    assert abs(float(loss) - float(ref)) < 1e-5, (float(loss), float(ref))

    print("KERNEL_OK")
</pallas_src>

<mosaic_0001>
module attributes {stable_mosaic.version = 11 : i64} {
  func.func @kernel(%arg0: i32, %arg1: memref<8x256xf32, #tpu.memory_space<vmem>>, %arg2: memref<8x256xf32, #tpu.memory_space<vmem>>, %arg3: memref<256x64xf32, #tpu.memory_space<vmem>>, %arg4: memref<64x16xf32, #tpu.memory_space<vmem>>, %arg5: memref<1x8x128xf32, #tpu.memory_space<vmem>>) attributes {dimension_semantics = [#tpu.dimension_semantics<parallel>], iteration_bounds = array<i64: 1>, scalar_prefetch = 0 : i64, scratch_operands = 0 : i64, tpu.core_type = #tpu.core_type<tc>, window_params = [{transform_indices = @transform_0, window_bounds = array<i64: 8, 256>}, {transform_indices = @transform_1, window_bounds = array<i64: 8, 256>}, {pipeline_mode = #tpu.pipeline_mode<synchronous>, transform_indices = @transform_2, window_bounds = array<i64: 256, 64>}, {pipeline_mode = #tpu.pipeline_mode<synchronous>, transform_indices = @transform_3, window_bounds = array<i64: 64, 16>}, {transform_indices = @transform_4, window_bounds = array<i64: 1, 8, 128>}]} {
    %c0 = arith.constant 0 : index
    %c0_0 = arith.constant 0 : index
    %0 = vector.load %arg1[%c0, %c0_0] : memref<8x256xf32, #tpu.memory_space<vmem>>, vector<8x256xf32>
    %c0_1 = arith.constant 0 : index
    %c0_2 = arith.constant 0 : index
    %1 = vector.load %arg2[%c0_1, %c0_2] : memref<8x256xf32, #tpu.memory_space<vmem>>, vector<8x256xf32>
    %2 = arith.subf %0, %1 : vector<8x256xf32>
    %3 = math.absf %2 : vector<8x256xf32>
    %4 = vector.shape_cast %3 : vector<8x256xf32> to vector<1x8x256xf32>
    %cst = arith.constant dense<0.000000e+00> : vector<1xf32>
    %5 = vector.multi_reduction <add>, %4, %cst [1, 2] : vector<1x8x256xf32> to vector<1xf32>
    %6 = vector.shape_cast %5 : vector<1xf32> to vector<1x1x1xf32>
    %7 = vector.extract %6[0, 0, 0] : f32 from vector<1x1x1xf32>
    %cst_3 = arith.constant 4.8828125E-4 : f32
    %8 = arith.mulf %cst_3, %7 : f32
    %c0_4 = arith.constant 0 : index
    %c0_5 = arith.constant 0 : index
    %9 = vector.load %arg3[%c0_4, %c0_5] : memref<256x64xf32, #tpu.memory_space<vmem>>, vector<256x64xf32>
    %cst_6 = arith.constant dense<0.000000e+00> : vector<8x64xf32>
    %10 = tpu.matmul %2, %9, %cst_6 {dimension_numbers = #tpu.dot_dimension_numbers<[1], [0], [0], [1], [0, 0, 1, 1], [], []>} : vector<8x256xf32>, vector<256x64xf32>, vector<8x64xf32> -> vector<8x64xf32>
    %11 = math.absf %10 : vector<8x64xf32>
    %12 = vector.shape_cast %11 : vector<8x64xf32> to vector<1x8x64xf32>
    %cst_7 = arith.constant dense<0.000000e+00> : vector<1xf32>
    %13 = vector.multi_reduction <add>, %12, %cst_7 [1, 2] : vector<1x8x64xf32> to vector<1xf32>
    %14 = vector.shape_cast %13 : vector<1xf32> to vector<1x1x1xf32>
    %15 = vector.extract %14[0, 0, 0] : f32 from vector<1x1x1xf32>
    %cst_8 = arith.constant 9.765625E-4 : f32
    %16 = arith.mulf %cst_8, %15 : f32
    %17 = arith.addf %8, %16 : f32
    %c0_9 = arith.constant 0 : index
    %c0_10 = arith.constant 0 : index
    %18 = vector.load %arg4[%c0_9, %c0_10] : memref<64x16xf32, #tpu.memory_space<vmem>>, vector<64x16xf32>
    %cst_11 = arith.constant dense<0.000000e+00> : vector<8x16xf32>
    %19 = tpu.matmul %10, %18, %cst_11 {dimension_numbers = #tpu.dot_dimension_numbers<[1], [0], [0], [1], [0, 0, 1, 1], [], []>} : vector<8x64xf32>, vector<64x16xf32>, vector<8x16xf32> -> vector<8x16xf32>
    %20 = math.absf %19 : vector<8x16xf32>
    %21 = vector.shape_cast %20 : vector<8x16xf32> to vector<1x8x16xf32>
    %cst_12 = arith.constant dense<0.000000e+00> : vector<1xf32>
    %22 = vector.multi_reduction <add>, %21, %cst_12 [1, 2] : vector<1x8x16xf32> to vector<1xf32>
    %23 = vector.shape_cast %22 : vector<1xf32> to vector<1x1x1xf32>
    %24 = vector.extract %23[0, 0, 0] : f32 from vector<1x1x1xf32>
    %cst_13 = arith.constant 0.001953125 : f32
    %25 = arith.mulf %cst_13, %24 : f32
    %26 = arith.addf %17, %25 : f32
    %27 = vector.broadcast %26 : f32 to vector<1x8x128xf32>
    %c0_14 = arith.constant 0 : index
    %c0_15 = arith.constant 0 : index
    %c0_16 = arith.constant 0 : index
    %28 = vector.load %arg5[%c0_14, %c0_15, %c0_16] : memref<1x8x128xf32, #tpu.memory_space<vmem>>, vector<1x8x128xf32>
    tpu.vector_store %arg5[%c0_14, %c0_15, %c0_16], %27 {strides = array<i32>} : memref<1x8x128xf32, #tpu.memory_space<vmem>>, vector<1x8x128xf32>,
    return
  }
  func.func @transform_0(%arg0: i32) -> (i32, i32) {
    %c0_i32 = arith.constant 0 : i32
    %c0_i32_0 = arith.constant 0 : i32
    return %arg0, %c0_i32 : i32, i32
  }
  func.func @transform_1(%arg0: i32) -> (i32, i32) {
    %c0_i32 = arith.constant 0 : i32
    %c0_i32_0 = arith.constant 0 : i32
    return %arg0, %c0_i32 : i32, i32
  }
  func.func @transform_2(%arg0: i32) -> (i32, i32) {
    %c0_i32 = arith.constant 0 : i32
    %c0_i32_0 = arith.constant 0 : i32
    %c0_i32_1 = arith.constant 0 : i32
    return %c0_i32, %c0_i32_0 : i32, i32
  }
  func.func @transform_3(%arg0: i32) -> (i32, i32) {
    %c0_i32 = arith.constant 0 : i32
    %c0_i32_0 = arith.constant 0 : i32
    %c0_i32_1 = arith.constant 0 : i32
    return %c0_i32, %c0_i32_0 : i32, i32
  }
  func.func @transform_4(%arg0: i32) -> (i32, i32, i32) {
    %c0_i32 = arith.constant 0 : i32
    %c0_i32_0 = arith.constant 0 : i32
    %c0_i32_1 = arith.constant 0 : i32
    return %arg0, %c0_i32, %c0_i32_0 : i32, i32, i32
  }
}

</mosaic_0001>

<bundles_post_ra>
// kernel: tpu_custom_call.1
= control target key start
LH: loop header
LB: loop body
LE: loop exit
PB: predicated region body
PF: predicated region fallthrough
CT: control target
= control target key end

     0   :  { %v406_v7 = vmov 0.0|0.0   ;;  %s583_s0 = inlined_call_operand.vmem [shape: f32[8,256], index: 0, kind: input, shape index: {}]   ;;  %s584_s1 = inlined_call_operand.vmem [shape: f32[8,256], index: 1, kind: input, shape index: {}]   ;;  %s585_s2 = inlined_call_operand.vmem [shape: f32[256,64], index: 2, kind: input, shape index: {}]   ;;  %s586_s3 = inlined_call_operand.vmem [shape: f32[64,16], index: 3, kind: input, shape index: {}]   ;;  %s587_s4 = inlined_call_operand.hbm [shape: f32[1,8,128], index: 4, kind: output, shape index: {}]  }
   0x1   :  { %v53_v0 = vld [vmem:[%s585_s2 + $0x80] sm:$0xff]  ;;  %v54_v1 = vld [vmem:[%s585_s2 + $0x88] sm:$0xff]  ;;  %v55_v5 = vld [vmem:[%s585_s2 + $0x90] sm:$0xff]  ;;  %360 = vmatprep.subr.bf16.mxu1 %v406_v7 }
   0x2   :  { %v37_v2 = vld [vmem:[%s585_s2] sm:$0xff]  ;;  %v328_v3 = vpack.c.bf16 %v54_v1, %v53_v0  ;;  %v38_v4 = vld [vmem:[%s585_s2 + $0x8] sm:$0xff]  ;;  %v56_v6 = vld [vmem:[%s585_s2 + $0x98] sm:$0xff] }
   0x3   :  { %v330_v8 = vpack.c.bf16 %v38_v4, %v37_v2  ;;  %v332_v9 = vpack.c.bf16 %v56_v6, %v55_v5  ;;  %v39_v10 = vld [vmem:[%s585_s2 + $0x10] sm:$0xff]  ;;  %v40_v11 = vld [vmem:[%s585_s2 + $0x18] sm:$0xff]  ;;  %v57_v12 = vld [vmem:[%s585_s2 + $0xa0] sm:$0xff] }
   0x4   :  { %329 = vmatprep.subr.bf16.mxu0 %v328_v3  ;;  %v58_v13 = vld [vmem:[%s585_s2 + $0xa8] sm:$0xff]  ;;  %v334_v14 = vpack.c.bf16 %v40_v11, %v39_v10  ;;  %v41_v16 = vld [vmem:[%s585_s2 + $0x20] sm:$0xff]  ;;  %v59_v18 = vld [vmem:[%s585_s2 + $0xb0] sm:$0xff] }
   0x5   :  { %331 = vmatpush3.bf16.msra.mxu0 %v330_v8  ;;  %v336_v15 = vpack.c.bf16 %v58_v13, %v57_v12  ;;  %v42_v17 = vld [vmem:[%s585_s2 + $0x28] sm:$0xff]  ;;  %v60_v19 = vld [vmem:[%s585_s2 + $0xb8] sm:$0xff]  ;;  %v43_v22 = vld [vmem:[%s585_s2 + $0x30] sm:$0xff] }
   0x6   :  { %333 = vmatprep.subr.bf16.mxu0 %v332_v9  ;;  %v338_v20 = vpack.c.bf16 %v42_v17, %v41_v16  ;;  %v340_v21 = vpack.c.bf16 %v60_v19, %v59_v18  ;;  %v44_v23 = vld [vmem:[%s585_s2 + $0x38] sm:$0xff]  ;;  %v61_v24 = vld [vmem:[%s585_s2 + $0xc0] sm:$0xff]  ;;  %v62_v25 = vld [vmem:[%s585_s2 + $0xc8] sm:$0xff] }
   0x7   :  { %v19_v26 = vld [vmem:[%s583_s0 + $0x8] sm:$0xff]  ;;  %v342_v28 = vpack.c.bf16 %v44_v23, %v43_v22  ;;  %v153_v30 = vld [vmem:[%s586_s3] sm:$0xff]  ;;  %v155_v32 = vld [vmem:[%s586_s3 + $0x10] sm:$0xff]  ;;  %v344_v33 = vpack.c.bf16 %v62_v25, %v61_v24 }
   0x8   :  { %v21_v27 = vld [vmem:[%s584_s1 + $0x8] sm:$0xff]  ;;  %v45_v34 = vld [vmem:[%s585_s2 + $0x40] sm:$0xff]  ;;  %v156_v37 = vld [vmem:[%s586_s3 + $0x18] sm:$0xff] }
   0x9   :  { %335 = vmatpush3.bf16.msra.mxu0 %v334_v14  ;;  %v23_v29 = vsub.f32 %v19_v26, %v21_v27  ;;  %v154_v31 = vld [vmem:[%s586_s3 + $0x8] sm:$0xff]  ;;  %v63_v38 = vld [vmem:[%s585_s2 + $0xd0] sm:$0xff]  ;;  %v64_v39 = vld [vmem:[%s585_s2 + $0xd8] sm:$0xff] }
   0xa   :  { %337 = vmatprep.subr.bf16.mxu0 %v336_v15  ;;  %v46_v35 = vld [vmem:[%s585_s2 + $0x48] sm:$0xff]  ;;  %v361_v36 = vpack.c.bf16 %v154_v31, %v153_v30 }
   0xb   :  { %133 = vmatprep.mubr.f32.mxu0 %v23_v29 }
   0xd   :  { %339 = vmatpush3.bf16.msra.mxu0 %v338_v20 }
   0xe   :  { %341 = vmatprep.subr.bf16.mxu0 %v340_v21 }
   0xf   :  { %9 = vsyncpa [#allocation3], 0  ;;  %362 = vmatpush3.bf16.msra.mxu1 %v361_v36  ;;  %v364_v40 = vpack.c.bf16 %v156_v37, %v155_v32  ;;  %v346_v41 = vpack.c.bf16 %v46_v35, %v45_v34  ;;  %v157_v42 = vld [vmem:[%s586_s3 + $0x20] sm:$0xff]  ;;  %v158_v43 = vld [vmem:[%s586_s3 + $0x28] sm:$0xff]  ;;  %v348_v44 = vpack.c.bf16 %v64_v39, %v63_v38  ;;  %v25_v4 = vand.u32 2147483647, %v23_v29 }
  0x10   :  { %363 = vmatprep.subr.bf16.mxu1 %v406_v7  ;;  %v47_v45 = vld [vmem:[%s585_s2 + $0x50] sm:$0xff]  ;;  %v48_v46 = vld [vmem:[%s585_s2 + $0x58] sm:$0xff]  ;;  %v65_v47 = vld [vmem:[%s585_s2 + $0xe0] sm:$0xff]  ;;  %v367_v49 = vpack.c.bf16 %v158_v43, %v157_v42  ;;  %vm407_vm0 = vmmov 0   ;;  %v408_v6 = vmov 0.0   ;;  %vm140_vm1 = vcmask 523264  }
  0x11   :  { %343 = vmatpush3.bf16.msra.mxu0 %v342_v28  ;;  %v66_v48 = vld [vmem:[%s585_s2 + $0xe8] sm:$0xff]  ;;  %v350_v50 = vpack.c.bf16 %v48_v46, %v47_v45  ;;  %v49_v52 = vld [vmem:[%s585_s2 + $0x60] sm:$0xff]  ;;  %v67_v54 = vld [vmem:[%s585_s2 + $0xf0] sm:$0xff]  ;;  %325 = vmatprep.mubr.msk.f32.mxu1 %vm407_vm0, %v408_v6  ;;  %vm235_vm2 = vcmask 130048   ;;  %s409_s28 = smov [#allocation2]  }
  0x12   :  { %345 = vmatprep.subr.bf16.mxu0 %v344_v33  ;;  %v352_v51 = vpack.c.bf16 %v66_v48, %v65_v47  ;;  %v50_v53 = vld [vmem:[%s585_s2 + $0x68] sm:$0xff]  ;;  %v68_v55 = vld [vmem:[%s585_s2 + $0xf8] sm:$0xff]  ;;  %v51_v58 = vld [vmem:[%s585_s2 + $0x70] sm:$0xff]  ;;  %s256_s29 = sshll.u32 %s409_s28, 4  ;;  %s257_s29 = int_to_ptr.vmem [resolvable:$true] %s256_s29 }
  0x13   :  { %365 = vmatpush3.bf16.msra.mxu1 %v364_v40  ;;  %v354_v56 = vpack.c.bf16 %v50_v53, %v49_v52  ;;  %v356_v57 = vpack.c.bf16 %v68_v55, %v67_v54  ;;  %v52_v59 = vld [vmem:[%s585_s2 + $0x78] sm:$0xff]  ;;  %v18_v61 = vld [vmem:[%s583_s0] sm:$0xff]  ;;  %v159_v0 = vld [vmem:[%s586_s3 + $0x30] sm:$0xff]  ;;  %s382_s5 = scalar_lea.vmem %s257_s29, 128  ;;  %p387_p1 = scmp.lt.s32.totalorder %s257_s29, %s257_s29 }
  0x14   :  { %366 = vmatprep.subr.bf16.mxu1 %v406_v7  ;;  %v358_v60 = vpack.c.bf16 %v52_v59, %v51_v58  ;;  %v20_v62 = vld [vmem:[%s584_s1] sm:$0xff]  ;;  %v160_v1 = vld [vmem:[%s586_s3 + $0x38] sm:$0xff]  ;;  %p383_p0 = scmp.ne.s32.totalorder %s257_s29, %s382_s5  ;;  %p388_p2 = scmp.lt.s32.totalorder %s382_s5, %s382_s5 }
  0x15   :  { %347 = vmatpush3.bf16.msra.mxu0 %v346_v41  ;;  %v22_v63 = vsub.f32 %v18_v61, %v20_v62  ;;  %v370_v2 = vpack.c.bf16 %v160_v1, %v159_v0 }
  0x16   :  { %349 = vmatprep.subr.bf16.mxu0 %v348_v44  ;;  %p389_p3 = por %p388_p2, %p387_p1 }
  0x17   :  { %368 = vmatpush3.bf16.msra.mxu1 %v367_v49  ;;  %v24_v3 = vand.u32 2147483647, %v22_v63 }
  0x18   :  { %369 = vmatprep.subr.bf16.mxu1 %v406_v7  ;;  %p390_p4 = pnand %p389_p3, %p383_p0 }
  0x19   :  { %351 = vmatpush3.bf16.msra.mxu0 %v350_v50  ;;  %v26_v5 = vadd.f32 %v25_v4, %v24_v3 }
  0x1a   :  { %353 = vmatprep.subr.bf16.mxu0 %v352_v51 }
  0x1b   :  { %371 = vmatpush3.bf16.msra.mxu1 %v370_v2  ;;  %27 = vadd.xlane.f32.xlu0 %v26_v5 }
  0x1d   :  { %355 = vmatpush3.bf16.msra.mxu0 %v354_v56 }
  0x1e   :  { %357 = vmatprep.subr.bf16.mxu0 %v356_v57 }
  0x21   :  { %359 = vmatpush3.bf16.msra.mxu0 %v358_v60 }
  0x24   :  { %134 = vmatmul.mubr.f32.vlgmr.msra.gmra.mrb[0].mxu0 %v22_v63 }
  0xa8   :  { %v28_v12 = vpop.xlane.xlu0 %27 }
  0xa9   :  { %v29_v13 = vrot.slane %v28_v12, 4 }
  0xab   :  { %v30_v14 = vadd.f32 %v29_v13, %v28_v12 }
  0xad   :  { %v31_v15 = vrot.slane %v30_v14, 2 }
  0xaf   :  { %v32_v16 = vadd.f32 %v31_v15, %v30_v14 }
  0xb1   :  { %v33_v17 = vrot.slane %v32_v16, 1 }
  0xb3   :  { %v34_v18 = vadd.f32 %v33_v17, %v32_v16 }
  0xb5   :  { %372 = vpush %v34_v18 }
  0xe6   :  { %s373_s0 = spop %372 }
  0xe7   :  { %s36_s3 = smul.f32 0.00048828125, %s373_s0 }
  0xf7   :  { %v297_v7 = vpop.f32.mrb[0].mxu0 }
  0xf8   :  { %v298_v8 = vpop.f32.mrb[1].mxu0 }
  0xf9   :  { %v299_v9 = vadd.f32 %v298_v8, %v297_v7 }
  0xfb   :  { %326 = vmatmul.mubr.msk.f32.vlgmr.msra.gmra.mrb[0].mxu1 %vm140_vm1, %v299_v9  ;;  %v139_v10 = vand.u32 2147483647, %v299_v9 }
  0xfd   :  { %v141_v11 = vsel %vm140_vm1, %v139_v10, 0.0 }
  0xfe   :  { %142 = vadd.xlane.f32.xlu0 %v141_v11 }
 0x18b   :  { %v143_v19 = vpop.xlane.xlu0 %142 }
 0x18c   :  { %v144_v20 = vrot.slane %v143_v19, 4 }
 0x18e   :  { %v145_v21 = vadd.f32 %v144_v20, %v143_v19 }
 0x190   :  { %v146_v22 = vrot.slane %v145_v21, 2 }
 0x192   :  { %v147_v23 = vadd.f32 %v146_v22, %v145_v21 }
 0x194   :  { %v148_v24 = vrot.slane %v147_v23, 1 }
 0x196   :  { %v149_v25 = vadd.f32 %v148_v24, %v147_v23 }
 0x198   :  { %374 = vpush %v149_v25 }
 0x1c9   :  { %s375_s1 = spop %374 }
 0x1ca   :  { %s151_s24 = smul.f32 0.0009765625, %s375_s1 }
 0x1cc   :  { %s152_s25 = sadd.f32 %s151_s24, %s36_s3 }
 0x1ce   :  { %v230_v26 = vpop.f32.mrb[0].mxu1 }
 0x1cf   :  { %v234_v27 = vand.u32 2147483647, %v230_v26  ;;  %v327_v28 = vpop.f32.mrb[1].mxu1 }
 0x1d1   :  { %v236_v29 = vsel %vm235_vm2, %v234_v27, 0.0 }
 0x1d2   :  { %237 = vadd.xlane.f32.xlu1 %v236_v29 }
 0x25f   :  { %v238_v30 = vpop.xlane.xlu1 %237 }
 0x260   :  { %v239_v31 = vrot.slane %v238_v30, 4 }
 0x262   :  { %v240_v32 = vadd.f32 %v239_v31, %v238_v30 }
 0x264   :  { %v241_v33 = vrot.slane %v240_v32, 2 }
 0x266   :  { %v242_v34 = vadd.f32 %v241_v33, %v240_v32 }
 0x268   :  { %v243_v35 = vrot.slane %v242_v34, 1 }
 0x26a   :  { %v244_v36 = vadd.f32 %v243_v35, %v242_v34 }
 0x26c   :  { %376 = vpush %v244_v36 }
 0x29d   :  { %s377_s26 = spop %376 }
 0x29e   :  { %s246_s27 = smul.f32 0.001953125, %s377_s26 }
 0x2a0   :  { %s247_s30 = sadd.f32 %s246_s27, %s152_s25 }
 0x2a2   :  { %v248_v37 = vstv %s247_s30 }
 0x2a3   :  { %249 = vst [vmem:[#allocation2] sm:$0xff] %v248_v37 }
 0x2a4   :  { %393 = shalt.err (!%p390_p4)
}
 0x2a5   :  { %s394_s8 = scalar_lea.hbm %s587_s4, 128 }
 0x2a6   :  { %p395_p5 = scmp.ne.s32.totalorder %s587_s4, %s394_s8  ;;  %p398_p6 = scmp.lt.u32.totalorder %s394_s8, %s587_s4 }
 0x2a8   :  { %p400_p7 = pnand %p398_p6, %p395_p5 }
 0x2aa   :  { %403 = shalt.err (!%p400_p7)
}
 0x2ab   :  { %259 = dma.vmem_to_hbm [thread:$0]  %s257_s29, 128, %s587_s4, [#allocation3]  }
 0x2ac   :  { %404 = dma.done.wait [#allocation3], 128  }
 0x2ad   :  { %405 = vsyncadd [#allocation3], 4294967168 }
 0x2ae   :  { %263 = vsyncpa [#allocation3], 1 }

</bundles_post_ra>
